<compile_context>
chip_gen: v7x
topology: tpu7x:2x2x1
jax: 0.10.0
libtpu: 0.0.40
codegen_flags: <defaults>
</compile_context>

<pallas_src>
import functools

import jax
import jax.numpy as jnp
from jax.experimental import pallas as pl
from jax.experimental.pallas import tpu as pltpu


def _weighted_ce_kernel(logits_ref, tgt_ref, cw_ref, num_ref, den_ref,
                        m_acc, l_acc, lt_acc, wt_acc, *,
                        n_rows, n_cols, tile_n, tile_c, row_pad, col_pad):
    i = pl.program_id(0)          # batch-tile index ("parallel")
    j = pl.program_id(1)          # class-tile index ("arbitrary" reduction)
    nc = pl.num_programs(1)

    # Reset the per-row online-softmax state at the start of each batch tile.
    @pl.when(j == 0)
    def _():
        m_acc[...] = jnp.full_like(m_acc, -jnp.inf)
        l_acc[...] = jnp.zeros_like(l_acc)
        lt_acc[...] = jnp.zeros_like(lt_acc)
        wt_acc[...] = jnp.zeros_like(wt_acc)

    x = logits_ref[...].astype(jnp.float32)            # (TN, TC)
    t = tgt_ref[...]                                    # (TN, 1) int32
    w = cw_ref[...].astype(jnp.float32)                 # (1, TC)

    # Global class index of every lane in this C-tile.
    col = jax.lax.broadcasted_iota(jnp.int32, x.shape, 1) + j * tile_c

    if col_pad:
        # Ragged last C-tile: neutralize garbage columns (finite large-negative
        # keeps exp() at exactly 0 and avoids inf-inf NaNs in the max/lse path).
        x = jnp.where(col < n_cols, x, -1e30)

    # ---- online logsumexp over the class axis (flash-style) ----
    m_prev = m_acc[...]
    m_new = jnp.maximum(m_prev, jnp.max(x, axis=-1, keepdims=True))      # (TN, 1)
    alpha = jnp.exp(m_prev - m_new)                                      # (TN, 1)
    l_acc[...] = alpha * l_acc[...] + jnp.sum(jnp.exp(x - m_new),
                                              axis=-1, keepdims=True)
    m_acc[...] = m_new

    # ---- one-hot gather of target logit and target class-weight ----
    # (no dynamic gather on TPU; compare/select on the VPU, lane reduce on XLU)
    onehot = col == t                                                    # (TN, TC)
    lt_acc[...] += jnp.sum(jnp.where(onehot, x, 0.0), axis=-1, keepdims=True)
    wt_acc[...] += jnp.sum(jnp.where(onehot, w, 0.0), axis=-1, keepdims=True)

    # ---- finalize this batch tile: per-row partial numerator/denominator ----
    @pl.when(j == nc - 1)
    def _():
        nll = m_acc[...] + jnp.log(l_acc[...]) - lt_acc[...]             # (TN, 1)
        w_t = wt_acc[...]                                                # (TN, 1)
        num = w_t * nll
        den = w_t
        if row_pad:
            # Ragged last batch tile: garbage rows may be NaN/Inf -> jnp.where
            # (not multiply) so they cannot poison the sums.
            row = jax.lax.broadcasted_iota(jnp.int32, num.shape, 0) + i * tile_n
            valid = row < n_rows
            num = jnp.where(valid, num, 0.0)
            den = jnp.where(valid, den, 0.0)
        num_ref[...] = num
        den_ref[...] = den


def weighted_cross_entropy_loss(logits, targets, class_weights, *,
                                logits_tile_bytes=2 * 1024 * 1024,
                                vmem_limit_bytes=48 * 1024 * 1024,
                                tile_n=None, tile_c=None):
    """Pallas TPU forward of WeightedCrossEntropyLoss.

    logits:        (N, C) float (f32 or bf16) — expert_outputs
    targets:       (N,)   integer class indices
    class_weights: (C,)   per-class weights
    Returns scalar float32 loss. (If sum of gathered weights is 0 the result is
    inf/NaN, matching torch.)
    """
    N, C = logits.shape
    itemsize = jnp.dtype(logits.dtype).itemsize

    # ---- class-axis tile: keep the full row when cheap, else a lane-dense
    #      multiple of 128 so the tile choice is independent of C.
    if tile_c is not None:
        tc = int(tile_c)
    elif C * itemsize * 16 <= logits_tile_bytes:     # >= 16 rows fit with full C
        tc = C
    else:
        tc = (logits_tile_bytes // (16 * itemsize)) // 128 * 128
        tc = max(128, min(2048, tc))
    col_pad = (tc != C) and (C % tc != 0)
    n_ctiles = pl.cdiv(C, tc)

    # ---- batch-axis tile from the byte budget (not a fixed row count).
    if tile_n is not None:
        tn = max(8, (int(tile_n) // 8) * 8)
    else:
        tn = logits_tile_bytes // (tc * itemsize)
        tn = max(8, (tn // 8) * 8)
    tn = min(tn, pl.cdiv(N, 8) * 8)                  # no point exceeding N
    row_pad = (N % tn) != 0
    n_btiles = pl.cdiv(N, tn)

    tgt2d = targets.astype(jnp.int32).reshape(N, 1)
    cw2d = class_weights.astype(jnp.float32).reshape(1, C)

    kernel = functools.partial(
        _weighted_ce_kernel,
        n_rows=N, n_cols=C, tile_n=tn, tile_c=tc,
        row_pad=row_pad, col_pad=col_pad)

    out_rows = n_btiles * tn
    cost = pl.CostEstimate(
        flops=8 * N * C,
        transcendentals=N * C + 2 * N,
        bytes_accessed=itemsize * N * C + 4 * N + 4 * C + 8 * out_rows,
    )

    num, den = pl.pallas_call(
        kernel,
        out_shape=(jax.ShapeDtypeStruct((out_rows, 1), jnp.float32),
                   jax.ShapeDtypeStruct((out_rows, 1), jnp.float32)),
        grid=(n_btiles, n_ctiles),
        in_specs=[
            pl.BlockSpec((tn, tc), lambda i, j: (i, j)),   # logits tile (pipelined)
            pl.BlockSpec((tn, 1), lambda i, j: (i, 0)),    # targets tile
            pl.BlockSpec((1, tc), lambda i, j: (0, j)),    # class-weight tile
        ],
        out_specs=[
            pl.BlockSpec((tn, 1), lambda i, j: (i, 0)),    # per-row w_t * nll
            pl.BlockSpec((tn, 1), lambda i, j: (i, 0)),    # per-row w_t
        ],
        scratch_shapes=[
            pltpu.VMEM((tn, 1), jnp.float32),   # running max m
            pltpu.VMEM((tn, 1), jnp.float32),   # running sum-exp l
            pltpu.VMEM((tn, 1), jnp.float32),   # gathered target logit
            pltpu.VMEM((tn, 1), jnp.float32),   # gathered target class weight
        ],
        compiler_params=pltpu.CompilerParams(
            dimension_semantics=("parallel", "arbitrary"),
            vmem_limit_bytes=vmem_limit_bytes,
        ),
        cost_estimate=cost,
    )(logits, tgt2d, cw2d)

    # Tiny final reduction + divide in JAX (also what exposes both v7x cores).
    return jnp.sum(num) / jnp.sum(den)


def _weighted_ce_ref(logits, targets, class_weights):
    # Pure-JAX reference matching torch.nn.CrossEntropyLoss(weight=w).
    logp = jax.nn.log_softmax(logits.astype(jnp.float32), axis=-1)
    t = targets.astype(jnp.int32)
    logpt = jnp.take_along_axis(logp, t[:, None], axis=-1)[:, 0]
    w_t = class_weights.astype(jnp.float32)[t]
    return jnp.sum(-w_t * logpt) / jnp.sum(w_t)


def _check(loss, ref):
    loss = jax.block_until_ready(loss)
    assert jnp.allclose(loss, ref, rtol=1e-5, atol=1e-6), (loss, ref)


if __name__ == "__main__":
    key = jax.random.PRNGKey(0)
    k1, k2, k3, k4, k5, k6, k7, k8 = jax.random.split(key, 8)

    # Case 1: module-convention small shapes (N, C), automatic tiling.
    N, C = 8, 4
    logits = jax.random.normal(k1, (N, C), dtype=jnp.float32)
    targets = jax.random.randint(k2, (N,), 0, C, dtype=jnp.int32)
    weights = jnp.array([1.0, 2.0, 0.5, 1.5], dtype=jnp.float32)
    _check(weighted_cross_entropy_loss(logits, targets, weights),
           _weighted_ce_ref(logits, targets, weights))

    # Case 2: ragged batch (no logits padding) + multi batch-tile grid.
    N2, C2 = 20, 4
    logits2 = jax.random.normal(k3, (N2, C2), dtype=jnp.float32)
    targets2 = jax.random.randint(k4, (N2,), 0, C2, dtype=jnp.int32)
    _check(weighted_cross_entropy_loss(logits2, targets2, weights, tile_n=8),
           _weighted_ce_ref(logits2, targets2, weights))

    # Case 3: class-axis tiling with online logsumexp (C multiple of tile_c).
    N3, C3 = 24, 384
    logits3 = jax.random.normal(k5, (N3, C3), dtype=jnp.float32)
    targets3 = jax.random.randint(k6, (N3,), 0, C3, dtype=jnp.int32)
    weights3 = jax.random.uniform(k7, (C3,), minval=0.5, maxval=2.0,
                                  dtype=jnp.float32)
    _check(weighted_cross_entropy_loss(logits3, targets3, weights3,
                                       tile_n=8, tile_c=128),
           _weighted_ce_ref(logits3, targets3, weights3))

    # Case 4: ragged class axis (C % tile_c != 0) exercises the column mask.
    N4, C4 = 16, 200
    logits4 = jax.random.normal(k8, (N4, C4), dtype=jnp.float32)
    targets4 = jax.random.randint(k2, (N4,), 0, C4, dtype=jnp.int32)
    weights4 = jax.random.uniform(k3, (C4,), minval=0.5, maxval=2.0,
                                  dtype=jnp.float32)
    _check(weighted_cross_entropy_loss(logits4, targets4, weights4,
                                       tile_n=8, tile_c=128),
           _weighted_ce_ref(logits4, targets4, weights4))

    print("KERNEL_OK")
</pallas_src>

<mosaic_0001>
module attributes {stable_mosaic.version = 11 : i64} {
  func.func @_weighted_ce_kernel(%arg0: i32, %arg1: i32, %arg2: memref<8x4xf32, #tpu.memory_space<vmem>>, %arg3: memref<8x1xi32, #tpu.memory_space<vmem>>, %arg4: memref<1x4xf32, #tpu.memory_space<vmem>>, %arg5: memref<8x1xf32, #tpu.memory_space<vmem>>, %arg6: memref<8x1xf32, #tpu.memory_space<vmem>>, %arg7: memref<8x1xf32, #tpu.memory_space<vmem>>, %arg8: memref<8x1xf32, #tpu.memory_space<vmem>>, %arg9: memref<8x1xf32, #tpu.memory_space<vmem>>, %arg10: memref<8x1xf32, #tpu.memory_space<vmem>>) attributes {dimension_semantics = [#tpu.dimension_semantics<parallel>, #tpu.dimension_semantics<arbitrary>], iteration_bounds = array<i64: 1, 1>, scalar_prefetch = 0 : i64, scratch_operands = 4 : i64, tpu.core_type = #tpu.core_type<tc>, window_params = [{transform_indices = @transform_0, window_bounds = array<i64: 8, 4>}, {transform_indices = @transform_1, window_bounds = array<i64: 8, 1>}, {transform_indices = @transform_2, window_bounds = array<i64: 1, 4>}, {transform_indices = @transform_3, window_bounds = array<i64: 8, 1>}, {transform_indices = @transform_4, window_bounds = array<i64: 8, 1>}]} {
    %c0_i32 = arith.constant 0 : i32
    %0 = arith.cmpi eq, %arg1, %c0_i32 : i32
    %1 = arith.extui %0 : i1 to i32
    %c0_i32_0 = arith.constant 0 : i32
    %2 = arith.cmpi ne, %1, %c0_i32_0 : i32
    scf.if %2 {
      %cst_29 = arith.constant 0xFF800000 : f32
      %47 = vector.broadcast %cst_29 : f32 to vector<8x1xf32>
      %c0_30 = arith.constant 0 : index
      %c0_31 = arith.constant 0 : index
      %48 = vector.load %arg7[%c0_30, %c0_31] : memref<8x1xf32, #tpu.memory_space<vmem>>, vector<8x1xf32>
      tpu.vector_store %arg7[%c0_30, %c0_31], %47 {strides = array<i32>} : memref<8x1xf32, #tpu.memory_space<vmem>>, vector<8x1xf32>,
      %cst_32 = arith.constant 0.000000e+00 : f32
      %49 = vector.broadcast %cst_32 : f32 to vector<8x1xf32>
      %c0_33 = arith.constant 0 : index
      %c0_34 = arith.constant 0 : index
      %50 = vector.load %arg8[%c0_33, %c0_34] : memref<8x1xf32, #tpu.memory_space<vmem>>, vector<8x1xf32>
      tpu.vector_store %arg8[%c0_33, %c0_34], %49 {strides = array<i32>} : memref<8x1xf32, #tpu.memory_space<vmem>>, vector<8x1xf32>,
      %cst_35 = arith.constant 0.000000e+00 : f32
      %51 = vector.broadcast %cst_35 : f32 to vector<8x1xf32>
      %c0_36 = arith.constant 0 : index
      %c0_37 = arith.constant 0 : index
      %52 = vector.load %arg9[%c0_36, %c0_37] : memref<8x1xf32, #tpu.memory_space<vmem>>, vector<8x1xf32>
      tpu.vector_store %arg9[%c0_36, %c0_37], %51 {strides = array<i32>} : memref<8x1xf32, #tpu.memory_space<vmem>>, vector<8x1xf32>,
      %cst_38 = arith.constant 0.000000e+00 : f32
      %53 = vector.broadcast %cst_38 : f32 to vector<8x1xf32>
      %c0_39 = arith.constant 0 : index
      %c0_40 = arith.constant 0 : index
      %54 = vector.load %arg10[%c0_39, %c0_40] : memref<8x1xf32, #tpu.memory_space<vmem>>, vector<8x1xf32>
      tpu.vector_store %arg10[%c0_39, %c0_40], %53 {strides = array<i32>} : memref<8x1xf32, #tpu.memory_space<vmem>>, vector<8x1xf32>,
    } else {
    }
    %c0 = arith.constant 0 : index
    %c0_1 = arith.constant 0 : index
    %3 = vector.load %arg2[%c0, %c0_1] : memref<8x4xf32, #tpu.memory_space<vmem>>, vector<8x4xf32>
    %c0_2 = arith.constant 0 : index
    %c0_3 = arith.constant 0 : index
    %4 = vector.load %arg3[%c0_2, %c0_3] : memref<8x1xi32, #tpu.memory_space<vmem>>, vector<8x1xi32>
    %c0_4 = arith.constant 0 : index
    %c0_5 = arith.constant 0 : index
    %5 = vector.load %arg4[%c0_4, %c0_5] : memref<1x4xf32, #tpu.memory_space<vmem>>, vector<1x4xf32>
    %6 = tpu.iota {dimensions = array<i32: 1>} : vector<8x4xi32>
    %c4_i32 = arith.constant 4 : i32
    %7 = arith.muli %arg1, %c4_i32 : i32
    %8 = vector.broadcast %7 : i32 to vector<8x4xi32>
    %9 = arith.addi %6, %8 : vector<8x4xi32>
    %c0_6 = arith.constant 0 : index
    %c0_7 = arith.constant 0 : index
    %10 = vector.load %arg7[%c0_6, %c0_7] : memref<8x1xf32, #tpu.memory_space<vmem>>, vector<8x1xf32>
    %cst = arith.constant dense<0xFF800000> : vector<8xf32>
    %11 = vector.multi_reduction <maximumf>, %3, %cst [1] : vector<8x4xf32> to vector<8xf32>
    %12 = vector.shape_cast %11 : vector<8xf32> to vector<8x1xf32>
    %13 = arith.maximumf %10, %12 : vector<8x1xf32>
    %14 = arith.subf %10, %13 : vector<8x1xf32>
    %15 = math.exp %14 : vector<8x1xf32>
    %c0_8 = arith.constant 0 : index
    %c0_9 = arith.constant 0 : index
    %16 = vector.load %arg8[%c0_8, %c0_9] : memref<8x1xf32, #tpu.memory_space<vmem>>, vector<8x1xf32>
    %17 = arith.mulf %15, %16 : vector<8x1xf32>
    %18 = vector.broadcast %13 : vector<8x1xf32> to vector<8x4xf32>
    %19 = arith.subf %3, %18 : vector<8x4xf32>
    %20 = math.exp %19 : vector<8x4xf32>
    %cst_10 = arith.constant dense<0.000000e+00> : vector<8xf32>
    %21 = vector.multi_reduction <add>, %20, %cst_10 [1] : vector<8x4xf32> to vector<8xf32>
    %22 = vector.shape_cast %21 : vector<8xf32> to vector<8x1xf32>
    %23 = arith.addf %17, %22 : vector<8x1xf32>
    %c0_11 = arith.constant 0 : index
    %c0_12 = arith.constant 0 : index
    %24 = vector.load %arg8[%c0_11, %c0_12] : memref<8x1xf32, #tpu.memory_space<vmem>>, vector<8x1xf32>
    tpu.vector_store %arg8[%c0_11, %c0_12], %23 {strides = array<i32>} : memref<8x1xf32, #tpu.memory_space<vmem>>, vector<8x1xf32>,
    %c0_13 = arith.constant 0 : index
    %c0_14 = arith.constant 0 : index
    %25 = vector.load %arg7[%c0_13, %c0_14] : memref<8x1xf32, #tpu.memory_space<vmem>>, vector<8x1xf32>
    tpu.vector_store %arg7[%c0_13, %c0_14], %13 {strides = array<i32>} : memref<8x1xf32, #tpu.memory_space<vmem>>, vector<8x1xf32>,
    %26 = vector.broadcast %4 : vector<8x1xi32> to vector<8x4xi32>
    %27 = arith.cmpi eq, %9, %26 : vector<8x4xi32>
    %c0_15 = arith.constant 0 : index
    %c0_16 = arith.constant 0 : index
    %28 = vector.load %arg9[%c0_15, %c0_16] : memref<8x1xf32, #tpu.memory_space<vmem>>, vector<8x1xf32>
    %cst_17 = arith.constant 0.000000e+00 : f32
    %29 = vector.broadcast %cst_17 : f32 to vector<8x4xf32>
    %30 = arith.select %27, %3, %29 : vector<8x4xi1>, vector<8x4xf32>
    %cst_18 = arith.constant dense<0.000000e+00> : vector<8xf32>
    %31 = vector.multi_reduction <add>, %30, %cst_18 [1] : vector<8x4xf32> to vector<8xf32>
    %32 = vector.shape_cast %31 : vector<8xf32> to vector<8x1xf32>
    %33 = arith.addf %28, %32 : vector<8x1xf32>
    %c0_19 = arith.constant 0 : index
    %c0_20 = arith.constant 0 : index
    %34 = vector.load %arg9[%c0_19, %c0_20] : memref<8x1xf32, #tpu.memory_space<vmem>>, vector<8x1xf32>
    tpu.vector_store %arg9[%c0_19, %c0_20], %33 {strides = array<i32>} : memref<8x1xf32, #tpu.memory_space<vmem>>, vector<8x1xf32>,
    %c0_21 = arith.constant 0 : index
    %c0_22 = arith.constant 0 : index
    %35 = vector.load %arg10[%c0_21, %c0_22] : memref<8x1xf32, #tpu.memory_space<vmem>>, vector<8x1xf32>
    %cst_23 = arith.constant 0.000000e+00 : f32
    %36 = vector.shape_cast %5 : vector<1x4xf32> to vector<1x4xf32>
    %37 = vector.broadcast %36 : vector<1x4xf32> to vector<8x4xf32>
    %38 = vector.broadcast %cst_23 : f32 to vector<8x4xf32>
    %39 = arith.select %27, %37, %38 : vector<8x4xi1>, vector<8x4xf32>
    %cst_24 = arith.constant dense<0.000000e+00> : vector<8xf32>
    %40 = vector.multi_reduction <add>, %39, %cst_24 [1] : vector<8x4xf32> to vector<8xf32>
    %41 = vector.shape_cast %40 : vector<8xf32> to vector<8x1xf32>
    %42 = arith.addf %35, %41 : vector<8x1xf32>
    %c0_25 = arith.constant 0 : index
    %c0_26 = arith.constant 0 : index
    %43 = vector.load %arg10[%c0_25, %c0_26] : memref<8x1xf32, #tpu.memory_space<vmem>>, vector<8x1xf32>
    tpu.vector_store %arg10[%c0_25, %c0_26], %42 {strides = array<i32>} : memref<8x1xf32, #tpu.memory_space<vmem>>, vector<8x1xf32>,
    %c0_i32_27 = arith.constant 0 : i32
    %44 = arith.cmpi eq, %arg1, %c0_i32_27 : i32
    %45 = arith.extui %44 : i1 to i32
    %c0_i32_28 = arith.constant 0 : i32
    %46 = arith.cmpi ne, %45, %c0_i32_28 : i32
    scf.if %46 {
      %c0_29 = arith.constant 0 : index
      %c0_30 = arith.constant 0 : index
      %47 = vector.load %arg7[%c0_29, %c0_30] : memref<8x1xf32, #tpu.memory_space<vmem>>, vector<8x1xf32>
      %c0_31 = arith.constant 0 : index
      %c0_32 = arith.constant 0 : index
      %48 = vector.load %arg8[%c0_31, %c0_32] : memref<8x1xf32, #tpu.memory_space<vmem>>, vector<8x1xf32>
      %49 = math.log %48 : vector<8x1xf32>
      %50 = arith.addf %47, %49 : vector<8x1xf32>
      %c0_33 = arith.constant 0 : index
      %c0_34 = arith.constant 0 : index
      %51 = vector.load %arg9[%c0_33, %c0_34] : memref<8x1xf32, #tpu.memory_space<vmem>>, vector<8x1xf32>
      %52 = arith.subf %50, %51 : vector<8x1xf32>
      %c0_35 = arith.constant 0 : index
      %c0_36 = arith.constant 0 : index
      %53 = vector.load %arg10[%c0_35, %c0_36] : memref<8x1xf32, #tpu.memory_space<vmem>>, vector<8x1xf32>
      %54 = arith.mulf %53, %52 : vector<8x1xf32>
      %c0_37 = arith.constant 0 : index
      %c0_38 = arith.constant 0 : index
      %55 = vector.load %arg5[%c0_37, %c0_38] : memref<8x1xf32, #tpu.memory_space<vmem>>, vector<8x1xf32>
      tpu.vector_store %arg5[%c0_37, %c0_38], %54 {strides = array<i32>} : memref<8x1xf32, #tpu.memory_space<vmem>>, vector<8x1xf32>,
      %c0_39 = arith.constant 0 : index
      %c0_40 = arith.constant 0 : index
      %56 = vector.load %arg6[%c0_39, %c0_40] : memref<8x1xf32, #tpu.memory_space<vmem>>, vector<8x1xf32>
      tpu.vector_store %arg6[%c0_39, %c0_40], %53 {strides = array<i32>} : memref<8x1xf32, #tpu.memory_space<vmem>>, vector<8x1xf32>,
    } else {
    }
    return
  }
  func.func @transform_0(%arg0: i32, %arg1: i32) -> (i32, i32) {
    %c0_i32 = arith.constant 0 : i32
    return %arg0, %arg1 : i32, i32
  }
  func.func @transform_1(%arg0: i32, %arg1: i32) -> (i32, i32) {
    %c0_i32 = arith.constant 0 : i32
    %c0_i32_0 = arith.constant 0 : i32
    return %arg0, %c0_i32 : i32, i32
  }
  func.func @transform_2(%arg0: i32, %arg1: i32) -> (i32, i32) {
    %c0_i32 = arith.constant 0 : i32
    %c0_i32_0 = arith.constant 0 : i32
    return %c0_i32, %arg1 : i32, i32
  }
  func.func @transform_3(%arg0: i32, %arg1: i32) -> (i32, i32) {
    %c0_i32 = arith.constant 0 : i32
    %c0_i32_0 = arith.constant 0 : i32
    return %arg0, %c0_i32 : i32, i32
  }
  func.func @transform_4(%arg0: i32, %arg1: i32) -> (i32, i32) {
    %c0_i32 = arith.constant 0 : i32
    %c0_i32_0 = arith.constant 0 : i32
    return %arg0, %c0_i32 : i32, i32
  }
}

</mosaic_0001>

<bundles_post_ra>
// kernel: tpu_custom_call.1
= control target key start
LH: loop header
LB: loop body
LE: loop exit
PB: predicated region body
PF: predicated region fallthrough
CT: control target
= control target key end

     0   :  { %vm34_vm0 = vcmask 31744   ;;  %vm20_vm1 = vcmask 7168   ;;  %v117_v1 = vmov -inf   ;;  %v118_v3 = vmov 0   ;;  %s174_s0 = inlined_call_operand.vmem [shape: f32[8,4], index: 0, kind: input, shape index: {}]   ;;  %s175_s1 = inlined_call_operand.vmem [shape: s32[8,1], index: 1, kind: input, shape index: {}]   ;;  %s176_s2 = inlined_call_operand.vmem [shape: f32[1,4], index: 2, kind: input, shape index: {}]   ;;  %s177_s4 = inlined_call_operand.vmem [shape: f32[8,1], index: 4, kind: output, shape index: {1}]   ;;  %s178_s3 = inlined_call_operand.vmem [shape: f32[8,1], index: 3, kind: output, shape index: {0}]  }
   0x1   :  { %v25_v0 = vld [vmem:[%s174_s0] sm:$0xff]  ;;  %21 = vst.msk [vmem:[#allocation2] sm:$0xff] %vm20_vm1, %v117_v1  ;;  %109 = vset.pattern.permute.xlu0 %v118_v3  ;;  %110 = vset.pattern.permute.xlu1 %v118_v3  ;;  %v119_v4 = vmov 0.0   ;;  %v28_v13 = vlaneseq }
   0x2   :  { %v35_v2 = vsel %vm34_vm0, %v25_v0, -inf  ;;  %22 = vst.msk [vmem:[#allocation3] sm:$0xff] %vm20_vm1, %v119_v4  ;;  %23 = vst.msk [vmem:[#allocation4] sm:$0xff] %vm20_vm1, %v119_v4  ;;  %v26_v5 = vld [vmem:[%s175_s1] sm:$0xff] }
   0x3   :  { %36 = vmax.xlane.f32.xlu0 %v35_v2  ;;  %24 = vst.msk [vmem:[#allocation5] sm:$0xff] %vm20_vm1, %v119_v4  ;;  %60 = vperm.xlu1 %110, %v26_v5   ;;  %v29_v14 = vand.u32 127, %v28_v13  ;;  %v105_v19 = vld [vmem:[%s176_s2] ss:$0 sm:$0xff] }
   0x8   :  { %v33_v6 = vld [vmem:[#allocation2] sm:$0xff] }
   0x9   :  { %v42_v25 = vld [vmem:[#allocation3] sm:$0xff]  ;;  %v63_v29 = vld [vmem:[#allocation4] sm:$0xff] }
   0xa   :  { %v70_v32 = vld [vmem:[#allocation5] sm:$0xff] }
  0x82   :  { %v61_v15 = vpop.permute.xlu1 %60 }
  0x83   :  { %vm62_vm2 = vcmp.eq.s32.totalorder %v29_v14, %v61_v15 }
  0x84   :  { %v64_v17 = vsel %vm62_vm2, %v25_v0, 0.0  ;;  %v77_v21 = vsel %vm62_vm2, %v105_v19, 0.0 }
  0x85   :  { %v65_v20 = vsel %vm34_vm0, %v64_v17, 0.0  ;;  %v78_v22 = vsel %vm34_vm0, %v77_v21, 0.0 }
  0x90   :  { %v37_v7 = vpop.xlane.xlu0 %36 }
  0x91   :  { %v38_v8 = vmax.f32 %v33_v6, %v37_v7 }
  0x93   :  { %v39_v9 = vsub.f32 %v33_v6, %v38_v8  ;;  %58 = vst.msk [vmem:[#allocation2] sm:$0xff] %vm20_vm1, %v38_v8  ;;  %46 = vperm.xlu0 %109, %v38_v8  }
  0x95   :  { %v40_v23 = vmul.f32 1.442695, %v39_v9 }
  0x9a   :  { %v86_v39 = vld [vmem:[#allocation2] sm:$0xff] }
 0x112   :  { %v47_v10 = vpop.permute.xlu0 %46 }
 0x113   :  { %v49_v11 = vsub.f32 %v25_v0, %v47_v10 }
 0x115   :  { %v50_v12 = vmul.f32 1.442695, %v49_v11 }
 0x117   :  { %111 = vpow2.f32 %v50_v12 }
 0x118   :  { %113 = vpow2.f32 %v40_v23 }
 0x121   :  { %v112_v16 = vpop.eup %111 }
 0x122   :  { %v52_v18 = vsel %vm34_vm0, %v112_v16, 0.0  ;;  %v114_v24 = vpop.eup %113 }
 0x123   :  { %53 = vadd.xlane.f32.xlu1 %v52_v18  ;;  %v43_v26 = vmul.f32 %v114_v24, %v42_v25 }
 0x127   :  { %66 = vadd.xlane.f32.xlu1 %v65_v20 }
 0x12b   :  { %79 = vadd.xlane.f32.xlu1 %v78_v22 }
 0x1b0   :  { %v54_v27 = vpop.xlane.xlu1 %53 }
 0x1b1   :  { %v55_v28 = vadd.f32 %v54_v27, %v43_v26 }
 0x1b3   :  { %57 = vst.msk [vmem:[#allocation3] sm:$0xff] %vm20_vm1, %v55_v28 }
 0x1b4   :  { %v67_v30 = vpop.xlane.xlu1 %66 }
 0x1b5   :  { %v68_v31 = vadd.f32 %v67_v30, %v63_v29 }
 0x1b7   :  { %69 = vst.msk [vmem:[#allocation4] sm:$0xff] %vm20_vm1, %v68_v31 }
 0x1b8   :  { %v80_v33 = vpop.xlane.xlu1 %79 }
 0x1b9   :  { %v81_v34 = vadd.f32 %v80_v33, %v70_v32 }
 0x1ba   :  { %v87_v35 = vld [vmem:[#allocation3] sm:$0xff] }
 0x1bb   :  { %115 = vlog2.f32 %v87_v35  ;;  %82 = vst.msk [vmem:[#allocation5] sm:$0xff] %vm20_vm1, %v81_v34 }
 0x1be   :  { %v91_v41 = vld [vmem:[#allocation4] sm:$0xff] }
 0x1c2   :  { %v93_v36 = vld [vmem:[#allocation5] sm:$0xff] }
 0x1c3   :  { %96 = vst.msk [vmem:[%s177_s4] sm:$0xff] %vm20_vm1, %v93_v36 }
 0x1c5   :  { %v116_v37 = vpop.eup %115 }
 0x1c6   :  { %v89_v38 = vmul.f32 0.6931472, %v116_v37 }
 0x1c8   :  { %v90_v40 = vadd.f32 %v89_v38, %v86_v39 }
 0x1ca   :  { %v92_v42 = vsub.f32 %v90_v40, %v91_v41 }
 0x1cc   :  { %v94_v43 = vmul.f32 %v93_v36, %v92_v42 }
 0x1ce   :  { %95 = vst.msk [vmem:[%s178_s3] sm:$0xff] %vm20_vm1, %v94_v43 }

</bundles_post_ra>
